<compile_context>
chip_gen: v6e
topology: v6e:2x2x1
jax: 0.10.0
libtpu: 0.0.40
codegen_flags: <defaults>
</compile_context>

<pallas_src>
import functools

import jax
import jax.numpy as jnp
from jax.experimental import pallas as pl
from jax.experimental.pallas import tpu as pltpu

MASK_FILL = -9000000000000000.0  # Python float -> literal in the jaxpr, never captured


def _row_tile(n, target=256):
    """Largest convenient row tile: full array when small, else a divisor tile."""
    if n <= target:
        return n
    for t in (target, 128, 64, 32, 16, 8):
        if n % t == 0:
            return t
    return n


# ---------------------------------------------------------------------------
# Kernel 1: pairwise squared L2 distances  D[i,j] = ||x1_i - x1_j||^2
# Tiled over (row-block, col-block); row norms precomputed once in the wrapper.
# ---------------------------------------------------------------------------
def _pdist_kernel(xr_ref, xc_ref, sqr_ref, sqc_ref, d_ref):
    gram = jax.lax.dot_general(                      # x_r @ x_c^T  (MXU)
        xr_ref[...], xc_ref[...],
        (((1,), (1,)), ((), ())), preferred_element_type=jnp.float32)
    d_ref[...] = jnp.maximum(sqr_ref[...] + sqc_ref[...] - 2.0 * gram, 0.0)


def pairwise_sq_dists(x1):
    x1 = x1.astype(jnp.float32)                      # keep f32: feeds median selection
    n, f = x1.shape
    sq = jnp.sum(x1 * x1, axis=1, keepdims=True)     # (N, 1), computed once in XLA
    t = _row_tile(n, 512)
    return pl.pallas_call(
        _pdist_kernel,
        grid=(n // t, n // t),
        in_specs=[
            pl.BlockSpec((t, f), lambda i, j: (i, 0)),   # row block of x
            pl.BlockSpec((t, f), lambda i, j: (j, 0)),   # col block of x
            pl.BlockSpec((t, 1), lambda i, j: (i, 0)),   # ||x_i||^2 column
            pl.BlockSpec((1, t), lambda i, j: (0, j)),   # ||x_j||^2 row
        ],
        out_specs=pl.BlockSpec((t, t), lambda i, j: (i, j)),
        out_shape=jax.ShapeDtypeStruct((n, n), jnp.float32),
        compiler_params=pltpu.CompilerParams(
            dimension_semantics=("parallel", "parallel")),
    )(x1, x1, sq, sq.T)


# ---------------------------------------------------------------------------
# Glue: hyperedge weights w(e).
# TODO(synk): median over a variable-size masked pair set has no clean Pallas
# primitive; kept as vectorized JAX (O(M*N^2*logN^2)) — replace with a
# selection / histogram median + Pallas masked-exp-sum when N grows.
# ---------------------------------------------------------------------------
def hyperedge_weights(x1, adj):
    n, m = adj.shape
    D = pairwise_sq_dists(x1)                        # (N, N) Pallas kernel

    iu = jnp.arange(n)
    upper = iu[:, None] < iu[None, :]                # i < j pairs (combinations)

    def one_edge(col):
        member = col > 0                             # (N,)
        cnt = jnp.sum(member.astype(jnp.int32))
        pair_mask = member[:, None] & member[None, :] & upper
        k = cnt * (cnt - 1) // 2                     # number of pairwise dists
        dvals = jnp.where(pair_mask, D, jnp.inf).reshape(-1)
        sorted_d = jnp.sort(dvals)
        # torch.median(): lower of the two middle values -> index (k-1)//2
        sigma = sorted_d[jnp.maximum((k - 1) // 2, 0)]
        # Guard sigma==0 (duplicate members): torch would produce NaN and assert;
        # clamp so the forward stays finite.
        sig2 = jnp.maximum(sigma * sigma, jnp.float32(1e-12))
        expd = jnp.where(pair_mask, jnp.exp(-D / sig2), 0.0)
        s = jnp.sum(expd)
        denom = jnp.maximum((cnt * (cnt - 1)).astype(jnp.float32), 1.0)
        return jnp.where(cnt >= 2, s / denom, 0.0)

    w = jax.vmap(one_edge)(adj.T.astype(jnp.float32))  # (M,)
    return w.reshape(m, 1).astype(jnp.float32)          # edge_attr = weights.T


# ---------------------------------------------------------------------------
# Kernel 2: fused multi-head masked attention.
#   per head h:  s = (q_h * scale) @ k_h^T ; s = where(adj>0, s, -9e15)
#                p = softmax(s) ; out_h = p @ (w * v)_h
#   output written lane-dense as (N, v_dim) = concat_h(out_h).
# ---------------------------------------------------------------------------
def _attn_kernel(x1_ref, x2_ref, vw_ref, adj_ref, o_ref, *,
                 heads, att_dim, vh_dim, scale):
    mask = adj_ref[...] > 0                          # int8 -> bool, (tn, M)
    k_all = x2_ref[...]                              # (M, QK) f32
    v_all = vw_ref[...]                              # (M, V)  f32 (edge weights folded)

    outs = []
    for h in range(heads):                           # static unroll over heads
        q = x1_ref[:, h * att_dim:(h + 1) * att_dim] * scale        # (tn, A) f32
        k = k_all[:, h * att_dim:(h + 1) * att_dim]                  # (M, A)
        s = jax.lax.dot_general(                                     # q @ k^T (bf16 MXU)
            q.astype(jnp.bfloat16), k.astype(jnp.bfloat16),
            (((1,), (1,)), ((), ())), preferred_element_type=jnp.float32)
        s = jnp.where(mask, s, MASK_FILL)
        s = s - jnp.max(s, axis=-1, keepdims=True)
        p = jnp.exp(s)
        p = p * pl.reciprocal(jnp.sum(p, axis=-1, keepdims=True), approx=True)
        vh = v_all[:, h * vh_dim:(h + 1) * vh_dim]                   # (M, Vh)
        outs.append(jnp.dot(p.astype(jnp.bfloat16), vh.astype(jnp.bfloat16),
                            preferred_element_type=jnp.float32))
    o_ref[...] = jnp.concatenate(outs, axis=-1).astype(o_ref.dtype)  # (tn, V) dense store


def masked_attention(x1, x2, v_weighted, adj_i8, *, heads, att_dim, vh_dim, scale):
    n, qk = x1.shape
    m, vdim = v_weighted.shape
    tn = _row_tile(n)
    kernel = functools.partial(_attn_kernel, heads=heads, att_dim=att_dim,
                               vh_dim=vh_dim, scale=scale)
    return pl.pallas_call(
        kernel,
        grid=(n // tn,),
        in_specs=[
            pl.BlockSpec((tn, qk), lambda i: (i, 0)),   # query rows
            pl.BlockSpec((m, qk), lambda i: (0, 0)),    # keys (resident)
            pl.BlockSpec((m, vdim), lambda i: (0, 0)),  # weighted values (resident)
            pl.BlockSpec((tn, m), lambda i: (i, 0)),    # incidence mask (int8)
        ],
        out_specs=pl.BlockSpec((tn, vdim), lambda i: (i, 0)),
        out_shape=jax.ShapeDtypeStruct((n, vdim), jnp.float32),
        compiler_params=pltpu.CompilerParams(dimension_semantics=("parallel",)),
    )(x1, x2, v_weighted, adj_i8)


# ---------------------------------------------------------------------------
# Module wrapper (mirrors Self_Attention.forward)
# ---------------------------------------------------------------------------
class SelfAttentionPallas:
    def __init__(self, in_features, qk_dim, v_dim, head_size, key):
        self.qk_dim = qk_dim
        self.v_dim = v_dim
        self.head_size = head_size
        self.att_dim = qk_dim // head_size
        self.scale = float(self.att_dim ** (-0.5))   # Python float (no captured consts)
        # linear_q / linear_k are defined in __init__ but never used in forward();
        # initialized only for shape fidelity (xavier-uniform style).
        kq, kk = jax.random.split(key)
        lim = (6.0 / (in_features + qk_dim)) ** 0.5
        self.linear_q_w = jax.random.uniform(kq, (qk_dim, in_features),
                                             minval=-lim, maxval=lim, dtype=jnp.float32)
        self.linear_k_w = jax.random.uniform(kk, (qk_dim, in_features),
                                             minval=-lim, maxval=lim, dtype=jnp.float32)

    def __call__(self, x1, x2, v, adj, edge_attr=None):
        # edge_attr argument is ignored (the torch forward recomputes it from x1/adj).
        del edge_attr
        x1 = x1.astype(jnp.float32)
        x2 = x2.astype(jnp.float32)
        v = v.astype(jnp.float32)

        edge_w = hyperedge_weights(x1, adj)              # (M, 1)
        v_weighted = edge_w * v                          # fold edge weights once (XLA fuses)
        adj_i8 = (adj > 0).astype(jnp.int8)              # 4x smaller DMA stream

        return masked_attention(
            x1, x2, v_weighted, adj_i8,
            heads=self.head_size, att_dim=self.att_dim,
            vh_dim=self.v_dim // self.head_size, scale=self.scale)   # (N, v_dim)


# ---------------------------------------------------------------------------
if __name__ == "__main__":
    key = jax.random.PRNGKey(0)
    k1, k2, k3, k4, k5 = jax.random.split(key, 5)

    N = 8          # nodes
    M = 8          # hyperedges
    QK_DIM = 32
    V_DIM = 32
    HEADS = 4

    x1 = jax.random.normal(k1, (N, QK_DIM), dtype=jnp.float32)
    x2 = jax.random.normal(k2, (M, QK_DIM), dtype=jnp.float32)
    v = jax.random.normal(k3, (M, V_DIM), dtype=jnp.float32)
    adj = (jax.random.uniform(k4, (N, M)) > 0.4).astype(jnp.float32)  # dense incidence

    mod = SelfAttentionPallas(QK_DIM, QK_DIM, V_DIM, HEADS, key=k5)
    out = mod(x1, x2, v, adj, edge_attr=None)
    jax.block_until_ready(out)

    assert out.shape == (N, V_DIM), out.shape
    assert not bool(jnp.any(jnp.isnan(out)))
    print("KERNEL_OK")
</pallas_src>

<mosaic_0001>
module attributes {stable_mosaic.version = 11 : i64} {
  func.func @_pdist_kernel(%arg0: i32, %arg1: i32, %arg2: memref<8x32xf32, #tpu.memory_space<vmem>>, %arg3: memref<8x32xf32, #tpu.memory_space<vmem>>, %arg4: memref<8x1xf32, #tpu.memory_space<vmem>>, %arg5: memref<1x8xf32, #tpu.memory_space<vmem>>, %arg6: memref<8x8xf32, #tpu.memory_space<vmem>>) attributes {dimension_semantics = [#tpu.dimension_semantics<parallel>, #tpu.dimension_semantics<parallel>], iteration_bounds = array<i64: 1, 1>, scalar_prefetch = 0 : i64, scratch_operands = 0 : i64, tpu.core_type = #tpu.core_type<tc>, window_params = [{transform_indices = @transform_0, window_bounds = array<i64: 8, 32>}, {transform_indices = @transform_1, window_bounds = array<i64: 8, 32>}, {transform_indices = @transform_2, window_bounds = array<i64: 8, 1>}, {transform_indices = @transform_3, window_bounds = array<i64: 1, 8>}, {transform_indices = @transform_4, window_bounds = array<i64: 8, 8>}]} {
    %c0 = arith.constant 0 : index
    %c0_0 = arith.constant 0 : index
    %0 = vector.load %arg2[%c0, %c0_0] : memref<8x32xf32, #tpu.memory_space<vmem>>, vector<8x32xf32>
    %c0_1 = arith.constant 0 : index
    %c0_2 = arith.constant 0 : index
    %1 = vector.load %arg3[%c0_1, %c0_2] : memref<8x32xf32, #tpu.memory_space<vmem>>, vector<8x32xf32>
    %cst = arith.constant dense<0.000000e+00> : vector<8x8xf32>
    %2 = tpu.matmul %0, %1, %cst {dimension_numbers = #tpu.dot_dimension_numbers<[1], [1], [0], [0], [0, 0, 1, 0], [], []>} : vector<8x32xf32>, vector<8x32xf32>, vector<8x8xf32> -> vector<8x8xf32>
    %c0_3 = arith.constant 0 : index
    %c0_4 = arith.constant 0 : index
    %3 = vector.load %arg4[%c0_3, %c0_4] : memref<8x1xf32, #tpu.memory_space<vmem>>, vector<8x1xf32>
    %c0_5 = arith.constant 0 : index
    %c0_6 = arith.constant 0 : index
    %4 = vector.load %arg5[%c0_5, %c0_6] : memref<1x8xf32, #tpu.memory_space<vmem>>, vector<1x8xf32>
    %5 = vector.broadcast %3 : vector<8x1xf32> to vector<8x8xf32>
    %6 = vector.broadcast %4 : vector<1x8xf32> to vector<8x8xf32>
    %7 = arith.addf %5, %6 : vector<8x8xf32>
    %cst_7 = arith.constant 2.000000e+00 : f32
    %8 = vector.broadcast %cst_7 : f32 to vector<8x8xf32>
    %9 = arith.mulf %8, %2 : vector<8x8xf32>
    %10 = arith.subf %7, %9 : vector<8x8xf32>
    %cst_8 = arith.constant 0.000000e+00 : f32
    %11 = vector.broadcast %cst_8 : f32 to vector<8x8xf32>
    %12 = arith.maximumf %10, %11 : vector<8x8xf32>
    %c0_9 = arith.constant 0 : index
    %c0_10 = arith.constant 0 : index
    %13 = vector.load %arg6[%c0_9, %c0_10] : memref<8x8xf32, #tpu.memory_space<vmem>>, vector<8x8xf32>
    tpu.vector_store %arg6[%c0_9, %c0_10], %12 {strides = array<i32>} : memref<8x8xf32, #tpu.memory_space<vmem>>, vector<8x8xf32>,
    return
  }
  func.func @transform_0(%arg0: i32, %arg1: i32) -> (i32, i32) {
    %c0_i32 = arith.constant 0 : i32
    %c0_i32_0 = arith.constant 0 : i32
    return %arg0, %c0_i32 : i32, i32
  }
  func.func @transform_1(%arg0: i32, %arg1: i32) -> (i32, i32) {
    %c0_i32 = arith.constant 0 : i32
    %c0_i32_0 = arith.constant 0 : i32
    return %arg1, %c0_i32 : i32, i32
  }
  func.func @transform_2(%arg0: i32, %arg1: i32) -> (i32, i32) {
    %c0_i32 = arith.constant 0 : i32
    %c0_i32_0 = arith.constant 0 : i32
    return %arg0, %c0_i32 : i32, i32
  }
  func.func @transform_3(%arg0: i32, %arg1: i32) -> (i32, i32) {
    %c0_i32 = arith.constant 0 : i32
    %c0_i32_0 = arith.constant 0 : i32
    return %c0_i32, %arg1 : i32, i32
  }
  func.func @transform_4(%arg0: i32, %arg1: i32) -> (i32, i32) {
    %c0_i32 = arith.constant 0 : i32
    return %arg0, %arg1 : i32, i32
  }
}

</mosaic_0001>

<bundles_post_ra>
// kernel: tpu_custom_call.1
= control target key start
LH: loop header
LB: loop body
LE: loop exit
PB: predicated region body
PF: predicated region fallthrough
CT: control target
= control target key end

     0   :  { %9 = vsyncpa [#allocation3], 0  ;;  %s248_s0 = inlined_call_operand.vmem [shape: f32[8,32], index: 0, kind: input, shape index: {}]   ;;  %s249_s1 = inlined_call_operand.hbm [shape: f32[8,32], index: 1, kind: input, shape index: {}]   ;;  %s250_s2 = inlined_call_operand.vmem [shape: f32[8,1], index: 2, kind: input, shape index: {}]   ;;  %s251_s3 = inlined_call_operand.vmem [shape: f32[1,8], index: 3, kind: input, shape index: {}]   ;;  %s252_s4 = inlined_call_operand.hbm [shape: f32[8,8], index: 4, kind: output, shape index: {}]  }
   0x1   :  { %10 = vsyncpa [#allocation4], 0  ;;  %s203_s15 = smov [#allocation2]  }
   0x2   :  { %s19_s16 = sshll.u32 %s203_s15, 4  ;;  %s20_s16 = int_to_ptr.vmem [resolvable:$true] %s19_s16 }
   0x3   :  { %s167_s17 = scalar_lea.vmem %s20_s16, 128  ;;  %p172_p1 = scmp.lt.s32.totalorder %s20_s16, %s20_s16 }
   0x4   :  { %p168_p0 = scmp.ne.s32.totalorder %s20_s16, %s167_s17  ;;  %p173_p2 = scmp.lt.s32.totalorder %s167_s17, %s167_s17 }
   0x6   :  { %p174_p3 = por %p173_p2, %p172_p1 }
   0x8   :  { %p175_p4 = pnand %p174_p3, %p168_p0 }
   0xa   :  { %178 = shalt.err (!%p175_p4)
}
   0xb   :  { %22 = dma.hbm_to_vmem [thread:$0]  %s249_s1, 128, %s20_s16, [#allocation3]  }
   0xc   :  { %199 = dma.done.wait [#allocation3], 128  }
   0xd   :  { %200 = vsyncadd [#allocation3], 4294967168  ;;  %v204_v0 = vmov 0.0   ;;  %vm205_vm0 = vmmov 0   ;;  %v206_v1 = vmov 0   ;;  %vm32_vm1 = vcmask 261120  }
   0xe   :  { %148 = vmatprep.subr.mxu0 %v204_v0  ;;  %150 = vmatprep.mubr.msk.f32.mxu0 %vm205_vm0, %v204_v0  ;;  %v31_v2 = vld [vmem:[#allocation2] sm:$0xff]  ;;  %s207_s25 = smov [#allocation5]   ;;  %vm126_vm2 = vcmask 64512  }
   0xf   :  { %158 = vset.pattern.permute.xlu0 %v206_v1  ;;  %v109_v3 = vld [vmem:[%s250_s2] sm:$0xff]  ;;  %149 = vmatpush3.xpose.msk.msra.mxu0 %vm32_vm1, %v31_v2  ;;  %s134_s26 = sshll.u32 %s207_s25, 4  ;;  %s135_s26 = int_to_ptr.vmem [resolvable:$true] %s134_s26 }
  0x10   :  { %v30_v4 = vld [vmem:[%s248_s0] sm:$0xff]  ;;  %113 = vperm.xlu0 %158, %v109_v3   ;;  %s179_s2 = scalar_lea.vmem %s135_s26, 128  ;;  %p184_p6 = scmp.lt.s32.totalorder %s135_s26, %s135_s26 }
  0x11   :  { %v145_v5 = vld [vmem:[%s251_s3] ss:$0 sm:$0xff]  ;;  %p180_p5 = scmp.ne.s32.totalorder %s135_s26, %s179_s2  ;;  %p185_p7 = scmp.lt.s32.totalorder %s179_s2, %s179_s2 }
  0x12   :  { %151 = vmatmul.mubr.msk.f32.vlgmr.msra.gmra.mxu0 %vm32_vm1, %v30_v4 }
  0x13   :  { %p186_p8 = por %p185_p7, %p184_p6 }
  0x15   :  { %p187_p9 = pnand %p186_p8, %p180_p5 }
  0x8b   :  { %v114_v6 = vpop.permute.xlu0 %113 }
  0x8c   :  { %v122_v7 = vadd.f32 %v145_v5, %v114_v6 }
  0xd2   :  { %v105_v8 = vpop.f32.mrf.mxu0 }
  0xd3   :  { %v123_v9 = vmul.f32 2.0, %v105_v8 }
  0xd4   :  { %v152_v10 = vpop.f32.mrf.mxu0 }
  0xd5   :  { %v124_v11 = vsub.f32 %v122_v7, %v123_v9 }
  0xd7   :  { %v125_v12 = vmax.f32 %v124_v11, 0.0 }
  0xd9   :  { %127 = vst.msk [vmem:[#allocation5] sm:$0xff] %vm126_vm2, %v125_v12 }
  0xda   :  { %190 = shalt.err (!%p187_p9)
}
  0xdb   :  { %137 = dma.vmem_to_hbm [thread:$0]  %s135_s26, 128, %s252_s4, [#allocation4]  }
  0xdc   :  { %201 = dma.done.wait [#allocation4], 128  }
  0xdd   :  { %202 = vsyncadd [#allocation4], 4294967168 }
  0xde   :  { %141 = vsyncpa [#allocation3], 1 }
  0xdf   :  { %142 = vsyncpa [#allocation4], 1 }

</bundles_post_ra>
